<compile_context>
chip_gen: v6e
topology: v6e:2x2x1
jax: 0.10.0
libtpu: 0.0.40
codegen_flags: <defaults>
</compile_context>

<pallas_src>
import functools

import jax
import jax.numpy as jnp
from jax.experimental import pallas as pl
from jax.experimental.pallas import tpu as pltpu


def _mlp_kernel(*refs, num_hidden: int, use_bf16: bool):
    """Fused MLP: [(x @ W_i + b_i) -> ReLU] * num_hidden, then x @ W_out + b_out.

    refs = (x_ref, w0, b0, w1, b1, ..., w_out, b_out, o_ref).
    All intermediate activations stay in VMEM / vregs.
    """
    x_ref = refs[0]
    o_ref = refs[-1]
    param_refs = refs[1:-1]

    x = x_ref[...]
    for li in range(num_hidden + 1):
        w = param_refs[2 * li][...]
        b = param_refs[2 * li + 1][...]  # (1, out_f) lane-major row, free broadcast
        if use_bf16:
            xm = x.astype(jnp.bfloat16)
            wm = w.astype(jnp.bfloat16)
        else:
            xm = x
            wm = w
        x = jnp.dot(xm, wm, preferred_element_type=jnp.float32) + b
        if li < num_hidden:
            x = jnp.maximum(x, 0.0)
    o_ref[...] = x.astype(o_ref.dtype)


def _round_up(n: int, m: int) -> int:
    return ((n + m - 1) // m) * m


def qnetwork_forward(x, hidden_params, out_params, *, block_batch=None,
                     use_bf16=False):
    """Forward pass identical to QNetwork.forward, as a single fused Pallas call.

    hidden_params: list of (W [in,out], b [out]) for the hidden Linear+ReLU layers.
    out_params:    (W [in,out], b [out]) for the final Linear (no activation).
    """
    batch, in_f = x.shape
    params = list(hidden_params) + [out_params]
    num_hidden = len(hidden_params)
    out_f = params[-1][0].shape[1]

    # Batch tile: multiple of 8 sublanes; cap so VMEM stays tiny.  For small
    # inference batches this is just the (padded) batch -> grid of 1.
    if block_batch is None:
        block_batch = min(_round_up(batch, 8), 256)
    padded = _round_up(batch, block_batch)
    if padded != batch:
        x = jnp.pad(x, ((0, padded - batch), (0, 0)))

    flat_inputs = [x]
    in_specs = [pl.BlockSpec((block_batch, in_f), lambda i: (i, 0))]
    for w, b in params:
        b2 = jnp.reshape(b, (1, -1))  # (1, out_f): lane-dense bias row
        flat_inputs += [w, b2]
        # Constant block index -> weights/biases stay resident across grid steps.
        in_specs += [
            pl.BlockSpec(w.shape, lambda i: (0, 0)),
            pl.BlockSpec(b2.shape, lambda i: (0, 0)),
        ]

    kernel = functools.partial(
        _mlp_kernel, num_hidden=num_hidden, use_bf16=use_bf16
    )
    out = pl.pallas_call(
        kernel,
        out_shape=jax.ShapeDtypeStruct((padded, out_f), jnp.float32),
        grid=(padded // block_batch,),
        in_specs=in_specs,
        out_specs=pl.BlockSpec((block_batch, out_f), lambda i: (i, 0)),
        compiler_params=pltpu.CompilerParams(
            dimension_semantics=("parallel",)  # shards batch across TCs on v7x
        ),
    )(*flat_inputs)
    return out[:batch]


def init_qnetwork_params(key, input_size, output_size, hidden_layers):
    """Deterministic init mimicking torch.nn.Linear (uniform +-1/sqrt(fan_in))."""
    sizes = [input_size] + list(hidden_layers)
    params = []
    for i in range(len(sizes) - 1):
        fan_in, fan_out = sizes[i], sizes[i + 1]
        key, kw, kb = jax.random.split(key, 3)
        bound = 1.0 / (fan_in ** 0.5)
        w = jax.random.uniform(kw, (fan_in, fan_out), jnp.float32, -bound, bound)
        b = jax.random.uniform(kb, (fan_out,), jnp.float32, -bound, bound)
        params.append((w, b))
    # output layer
    fan_in = sizes[-1]
    key, kw, kb = jax.random.split(key, 3)
    bound = 1.0 / (fan_in ** 0.5)
    w = jax.random.uniform(kw, (fan_in, output_size), jnp.float32, -bound, bound)
    b = jax.random.uniform(kb, (output_size,), jnp.float32, -bound, bound)
    out_params = (w, b)
    return params, out_params


if __name__ == "__main__":
    # Small shapes consistent with the module: batch=8, input=32, hidden=[64,32], out=8
    batch = 8
    input_size = 32
    hidden_layers = [64, 32]
    output_size = 8

    key = jax.random.PRNGKey(0)
    key, kx = jax.random.split(key)
    x = jax.random.normal(kx, (batch, input_size), jnp.float32)

    hidden_params, out_params = init_qnetwork_params(
        key, input_size, output_size, hidden_layers
    )

    y = qnetwork_forward(x, hidden_params, out_params)
    y = jax.block_until_ready(y)

    # Reference check in plain JAX (same math) to make sure the fused kernel is correct.
    ref = x
    for w, b in hidden_params:
        ref = jnp.maximum(ref @ w + b, 0.0)
    ref = ref @ out_params[0] + out_params[1]
    assert y.shape == (batch, output_size)
    assert jnp.allclose(y, ref, atol=1e-5, rtol=1e-5)

    print("KERNEL_OK")
</pallas_src>

<mosaic_0001>
module attributes {stable_mosaic.version = 11 : i64} {
  func.func @_mlp_kernel(%arg0: i32, %arg1: memref<8x32xf32, #tpu.memory_space<vmem>>, %arg2: memref<32x64xf32, #tpu.memory_space<vmem>>, %arg3: memref<1x64xf32, #tpu.memory_space<vmem>>, %arg4: memref<64x32xf32, #tpu.memory_space<vmem>>, %arg5: memref<1x32xf32, #tpu.memory_space<vmem>>, %arg6: memref<32x8xf32, #tpu.memory_space<vmem>>, %arg7: memref<1x8xf32, #tpu.memory_space<vmem>>, %arg8: memref<8x8xf32, #tpu.memory_space<vmem>>) attributes {dimension_semantics = [#tpu.dimension_semantics<parallel>], iteration_bounds = array<i64: 1>, scalar_prefetch = 0 : i64, scratch_operands = 0 : i64, tpu.core_type = #tpu.core_type<tc>, window_params = [{transform_indices = @transform_0, window_bounds = array<i64: 8, 32>}, {pipeline_mode = #tpu.pipeline_mode<synchronous>, transform_indices = @transform_1, window_bounds = array<i64: 32, 64>}, {pipeline_mode = #tpu.pipeline_mode<synchronous>, transform_indices = @transform_2, window_bounds = array<i64: 1, 64>}, {pipeline_mode = #tpu.pipeline_mode<synchronous>, transform_indices = @transform_3, window_bounds = array<i64: 64, 32>}, {pipeline_mode = #tpu.pipeline_mode<synchronous>, transform_indices = @transform_4, window_bounds = array<i64: 1, 32>}, {pipeline_mode = #tpu.pipeline_mode<synchronous>, transform_indices = @transform_5, window_bounds = array<i64: 32, 8>}, {pipeline_mode = #tpu.pipeline_mode<synchronous>, transform_indices = @transform_6, window_bounds = array<i64: 1, 8>}, {transform_indices = @transform_7, window_bounds = array<i64: 8, 8>}]} {
    %c0 = arith.constant 0 : index
    %c0_0 = arith.constant 0 : index
    %0 = vector.load %arg1[%c0, %c0_0] : memref<8x32xf32, #tpu.memory_space<vmem>>, vector<8x32xf32>
    %c0_1 = arith.constant 0 : index
    %c0_2 = arith.constant 0 : index
    %1 = vector.load %arg2[%c0_1, %c0_2] : memref<32x64xf32, #tpu.memory_space<vmem>>, vector<32x64xf32>
    %c0_3 = arith.constant 0 : index
    %c0_4 = arith.constant 0 : index
    %2 = vector.load %arg3[%c0_3, %c0_4] : memref<1x64xf32, #tpu.memory_space<vmem>>, vector<1x64xf32>
    %cst = arith.constant dense<0.000000e+00> : vector<8x64xf32>
    %3 = tpu.matmul %0, %1, %cst {dimension_numbers = #tpu.dot_dimension_numbers<[1], [0], [0], [1], [0, 0, 1, 1], [], []>} : vector<8x32xf32>, vector<32x64xf32>, vector<8x64xf32> -> vector<8x64xf32>
    %4 = vector.broadcast %2 : vector<1x64xf32> to vector<8x64xf32>
    %5 = arith.addf %3, %4 : vector<8x64xf32>
    %cst_5 = arith.constant 0.000000e+00 : f32
    %6 = vector.broadcast %cst_5 : f32 to vector<8x64xf32>
    %7 = arith.maximumf %5, %6 : vector<8x64xf32>
    %c0_6 = arith.constant 0 : index
    %c0_7 = arith.constant 0 : index
    %8 = vector.load %arg4[%c0_6, %c0_7] : memref<64x32xf32, #tpu.memory_space<vmem>>, vector<64x32xf32>
    %c0_8 = arith.constant 0 : index
    %c0_9 = arith.constant 0 : index
    %9 = vector.load %arg5[%c0_8, %c0_9] : memref<1x32xf32, #tpu.memory_space<vmem>>, vector<1x32xf32>
    %cst_10 = arith.constant dense<0.000000e+00> : vector<8x32xf32>
    %10 = tpu.matmul %7, %8, %cst_10 {dimension_numbers = #tpu.dot_dimension_numbers<[1], [0], [0], [1], [0, 0, 1, 1], [], []>} : vector<8x64xf32>, vector<64x32xf32>, vector<8x32xf32> -> vector<8x32xf32>
    %11 = vector.broadcast %9 : vector<1x32xf32> to vector<8x32xf32>
    %12 = arith.addf %10, %11 : vector<8x32xf32>
    %cst_11 = arith.constant 0.000000e+00 : f32
    %13 = vector.broadcast %cst_11 : f32 to vector<8x32xf32>
    %14 = arith.maximumf %12, %13 : vector<8x32xf32>
    %c0_12 = arith.constant 0 : index
    %c0_13 = arith.constant 0 : index
    %15 = vector.load %arg6[%c0_12, %c0_13] : memref<32x8xf32, #tpu.memory_space<vmem>>, vector<32x8xf32>
    %c0_14 = arith.constant 0 : index
    %c0_15 = arith.constant 0 : index
    %16 = vector.load %arg7[%c0_14, %c0_15] : memref<1x8xf32, #tpu.memory_space<vmem>>, vector<1x8xf32>
    %cst_16 = arith.constant dense<0.000000e+00> : vector<8x8xf32>
    %17 = tpu.matmul %14, %15, %cst_16 {dimension_numbers = #tpu.dot_dimension_numbers<[1], [0], [0], [1], [0, 0, 1, 1], [], []>} : vector<8x32xf32>, vector<32x8xf32>, vector<8x8xf32> -> vector<8x8xf32>
    %18 = vector.broadcast %16 : vector<1x8xf32> to vector<8x8xf32>
    %19 = arith.addf %17, %18 : vector<8x8xf32>
    %c0_17 = arith.constant 0 : index
    %c0_18 = arith.constant 0 : index
    %20 = vector.load %arg8[%c0_17, %c0_18] : memref<8x8xf32, #tpu.memory_space<vmem>>, vector<8x8xf32>
    tpu.vector_store %arg8[%c0_17, %c0_18], %19 {strides = array<i32>} : memref<8x8xf32, #tpu.memory_space<vmem>>, vector<8x8xf32>,
    return
  }
  func.func @transform_0(%arg0: i32) -> (i32, i32) {
    %c0_i32 = arith.constant 0 : i32
    %c0_i32_0 = arith.constant 0 : i32
    return %arg0, %c0_i32 : i32, i32
  }
  func.func @transform_1(%arg0: i32) -> (i32, i32) {
    %c0_i32 = arith.constant 0 : i32
    %c0_i32_0 = arith.constant 0 : i32
    %c0_i32_1 = arith.constant 0 : i32
    return %c0_i32, %c0_i32_0 : i32, i32
  }
  func.func @transform_2(%arg0: i32) -> (i32, i32) {
    %c0_i32 = arith.constant 0 : i32
    %c0_i32_0 = arith.constant 0 : i32
    %c0_i32_1 = arith.constant 0 : i32
    return %c0_i32, %c0_i32_0 : i32, i32
  }
  func.func @transform_3(%arg0: i32) -> (i32, i32) {
    %c0_i32 = arith.constant 0 : i32
    %c0_i32_0 = arith.constant 0 : i32
    %c0_i32_1 = arith.constant 0 : i32
    return %c0_i32, %c0_i32_0 : i32, i32
  }
  func.func @transform_4(%arg0: i32) -> (i32, i32) {
    %c0_i32 = arith.constant 0 : i32
    %c0_i32_0 = arith.constant 0 : i32
    %c0_i32_1 = arith.constant 0 : i32
    return %c0_i32, %c0_i32_0 : i32, i32
  }
  func.func @transform_5(%arg0: i32) -> (i32, i32) {
    %c0_i32 = arith.constant 0 : i32
    %c0_i32_0 = arith.constant 0 : i32
    %c0_i32_1 = arith.constant 0 : i32
    return %c0_i32, %c0_i32_0 : i32, i32
  }
  func.func @transform_6(%arg0: i32) -> (i32, i32) {
    %c0_i32 = arith.constant 0 : i32
    %c0_i32_0 = arith.constant 0 : i32
    %c0_i32_1 = arith.constant 0 : i32
    return %c0_i32, %c0_i32_0 : i32, i32
  }
  func.func @transform_7(%arg0: i32) -> (i32, i32) {
    %c0_i32 = arith.constant 0 : i32
    %c0_i32_0 = arith.constant 0 : i32
    return %arg0, %c0_i32 : i32, i32
  }
}

</mosaic_0001>

<bundles_post_ra>
// kernel: tpu_custom_call.1
= control target key start
LH: loop header
LB: loop body
LE: loop exit
PB: predicated region body
PF: predicated region fallthrough
CT: control target
= control target key end

     0   :  { %v395_v1 = vmov 0.0   ;;  %vm396_vm0 = vmmov 0   ;;  %s506_s0 = inlined_call_operand.vmem [shape: f32[8,32], index: 0, kind: input, shape index: {}]   ;;  %s507_s1 = inlined_call_operand.vmem [shape: f32[32,64], index: 1, kind: input, shape index: {}]   ;;  %s508_s2 = inlined_call_operand.vmem [shape: f32[1,64], index: 2, kind: input, shape index: {}]   ;;  %s509_s3 = inlined_call_operand.vmem [shape: f32[64,32], index: 3, kind: input, shape index: {}]   ;;  %s510_s4 = inlined_call_operand.vmem [shape: f32[1,32], index: 4, kind: input, shape index: {}]   ;;  %s511_s5 = inlined_call_operand.vmem [shape: f32[32,8], index: 5, kind: input, shape index: {}]   ;;  %s512_s6 = inlined_call_operand.vmem [shape: f32[1,8], index: 6, kind: input, shape index: {}]   ;;  %s513_s7 = inlined_call_operand.hbm [shape: f32[8,8], index: 7, kind: output, shape index: {}]  }
   0x1   :  { %v31_v0 = vld [vmem:[%s507_s1 + $0x18] sm:$0xff]  ;;  %329 = vmatprep.subr.mxu0 %v395_v1  ;;  %v30_v2 = vld [vmem:[%s507_s1 + $0x10] sm:$0xff]  ;;  %337 = vmatprep.mubr.msk.f32.mxu0 %vm396_vm0, %v395_v1  ;;  %v29_v5 = vld [vmem:[%s507_s1 + $0x8] sm:$0xff] }
   0x2   :  { %v121_v3 = vld [vmem:[%s509_s3 + $0x38] sm:$0xff]  ;;  %330 = vmatpush3.msra.mxu0 %v31_v0  ;;  %340 = vmatprep.subr.mxu1 %v395_v1  ;;  %v120_v4 = vld [vmem:[%s509_s3 + $0x30] sm:$0xff] }
   0x3   :  { %331 = vmatprep.subr.mxu0 %v395_v1  ;;  %341 = vmatpush3.msra.mxu1 %v121_v3 }
   0x4   :  { %12 = vsyncpa [#allocation3], 0  ;;  %332 = vmatpush3.msra.mxu0 %v30_v2  ;;  %342 = vmatprep.subr.mxu1 %v395_v1  ;;  %v119_v6 = vld [vmem:[%s509_s3 + $0x28] sm:$0xff]  ;;  %v28_v7 = vld [vmem:[%s507_s1] sm:$0xff]  ;;  %vm39_vm1 = vcmask 261120   ;;  %vm129_vm2 = vcmask 523264  }
   0x5   :  { %333 = vmatprep.subr.mxu0 %v395_v1  ;;  %343 = vmatpush3.msra.mxu1 %v120_v4  ;;  %v27_v8 = vld [vmem:[%s506_s0] sm:$0xff]  ;;  %v117_v10 = vld [vmem:[%s509_s3 + $0x18] sm:$0xff]  ;;  %v116_v11 = vld [vmem:[%s509_s3 + $0x10] sm:$0xff]  ;;  %s397_s14 = smov [#allocation2]   ;;  %vm288_vm3 = vcmask 64512  }
   0x6   :  { %334 = vmatpush3.msra.mxu0 %v29_v5  ;;  %344 = vmatprep.subr.mxu1 %v395_v1  ;;  %v118_v9 = vld [vmem:[%s509_s3 + $0x20] sm:$0xff]  ;;  %v115_v12 = vld [vmem:[%s509_s3 + $0x8] sm:$0xff]  ;;  %v207_v14 = vld [vmem:[%s511_s5 + $0x18] sm:$0xff]  ;;  %s296_s15 = sshll.u32 %s397_s14, 4  ;;  %s297_s15 = int_to_ptr.vmem [resolvable:$true] %s296_s15 }
   0x7   :  { %335 = vmatprep.subr.mxu0 %v395_v1  ;;  %345 = vmatpush3.msra.mxu1 %v119_v6  ;;  %v114_v13 = vld [vmem:[%s509_s3] sm:$0xff]  ;;  %v206_v20 = vld [vmem:[%s511_s5 + $0x10] sm:$0xff]  ;;  %v205_v21 = vld [vmem:[%s511_s5 + $0x8] sm:$0xff]  ;;  %p378_p1 = scmp.lt.s32.totalorder %s297_s15, %s297_s15 }
   0x8   :  { %336 = vmatpush3.msra.mxu0 %v28_v7  ;;  %346 = vmatprep.subr.mxu1 %v395_v1  ;;  %v304_v15 = vld [vmem:[%s508_s2] ss:$0 sm:$0xff] }
   0x9   :  { %338 = vmatmul.mubr.msk.f32.vlgmr.msra.gmra.mxu0 %vm39_vm1, %v27_v8  ;;  %347 = vmatpush3.msra.mxu1 %v118_v9  ;;  %v204_v22 = vld [vmem:[%s511_s5] sm:$0xff]  ;;  %s373_s5 = scalar_lea.vmem %s297_s15, 128 }
   0xa   :  { %348 = vmatprep.subr.mxu1 %v395_v1  ;;  %356 = vmatprep.mubr.msk.f32.mxu1 %vm396_vm0, %v395_v1  ;;  %v306_v23 = vld [vmem:[%s510_s4] ss:$0 sm:$0xff]  ;;  %p374_p0 = scmp.ne.s32.totalorder %s297_s15, %s373_s5  ;;  %p379_p2 = scmp.lt.s32.totalorder %s373_s5, %s373_s5 }
   0xb   :  { %349 = vmatpush3.msra.mxu1 %v117_v10  ;;  %359 = vmatprep.subr.mxu0 %v395_v1  ;;  %v308_v28 = vld [vmem:[%s512_s6] ss:$0 sm:$0xff] }
   0xc   :  { %350 = vmatprep.subr.mxu1 %v395_v1  ;;  %367 = vmatprep.mubr.msk.f32.mxu0 %vm396_vm0, %v395_v1  ;;  %p380_p3 = por %p379_p2, %p378_p1 }
   0xd   :  { %351 = vmatpush3.msra.mxu1 %v116_v11  ;;  %360 = vmatpush3.msra.mxu0 %v207_v14 }
   0xe   :  { %352 = vmatprep.subr.mxu1 %v395_v1  ;;  %361 = vmatprep.subr.mxu0 %v395_v1  ;;  %p381_p4 = pnand %p380_p3, %p374_p0 }
   0xf   :  { %353 = vmatpush3.msra.mxu1 %v115_v12  ;;  %362 = vmatpush3.msra.mxu0 %v206_v20 }
  0x10   :  { %354 = vmatprep.subr.mxu1 %v395_v1  ;;  %363 = vmatprep.subr.mxu0 %v395_v1 }
  0x11   :  { %355 = vmatpush3.msra.mxu1 %v114_v13  ;;  %364 = vmatpush3.msra.mxu0 %v205_v21 }
  0x12   :  { %365 = vmatprep.subr.mxu0 %v395_v1 }
  0x13   :  { %366 = vmatpush3.msra.mxu0 %v204_v22 }
  0xc9   :  { %v109_v16 = vpop.f32.mrf.mxu0 }
  0xca   :  { %v110_v17 = vadd.f32 %v304_v15, %v109_v16 }
  0xcb   :  { %v339_v18 = vpop.f32.mrf.mxu0 }
  0xcc   :  { %v113_v19 = vmax.f32 %v110_v17, 0.0 }
  0xce   :  { %357 = vmatmul.mubr.msk.f32.vlgmr.msra.gmra.mxu1 %vm129_vm2, %v113_v19 }
 0x18e   :  { %v199_v24 = vpop.f32.mrf.mxu1 }
 0x18f   :  { %v200_v25 = vadd.f32 %v306_v23, %v199_v24 }
 0x190   :  { %v358_v26 = vpop.f32.mrf.mxu1 }
 0x191   :  { %v203_v27 = vmax.f32 %v200_v25, 0.0 }
 0x193   :  { %368 = vmatmul.mubr.msk.f32.vlgmr.msra.gmra.mxu0 %vm39_vm1, %v203_v27 }
 0x253   :  { %v284_v29 = vpop.f32.mrf.mxu0 }
 0x254   :  { %v285_v30 = vadd.f32 %v308_v28, %v284_v29 }
 0x255   :  { %v369_v31 = vpop.f32.mrf.mxu0 }
 0x256   :  { %289 = vst.msk [vmem:[#allocation2] sm:$0xff] %vm288_vm3, %v285_v30 }
 0x257   :  { %384 = shalt.err (!%p381_p4)
}
 0x258   :  { %299 = dma.vmem_to_hbm [thread:$0]  %s297_s15, 128, %s513_s7, [#allocation3]  }
 0x259   :  { %393 = dma.done.wait [#allocation3], 128  }
 0x25a   :  { %394 = vsyncadd [#allocation3], 4294967168 }
 0x25b   :  { %303 = vsyncpa [#allocation3], 1 }

</bundles_post_ra>
